<compile_context>
chip_gen: v5e
topology: v5e:2x2
jax: 0.10.0
libtpu: 0.0.40
codegen_flags: <defaults>
</compile_context>

<pallas_src>
import functools

import jax
import jax.numpy as jnp
from jax import lax
from jax.experimental import pallas as pl
from jax.experimental.pallas import tpu as pltpu

_EPS = 1e-12
_NEG = -1e30      # "minus infinity" that cannot create inf-inf NaNs; exp -> 0


def _norm_rows(x):
    """F.normalize(x, p=2, dim=-1): x * rsqrt(max(||x||^2, eps^2)) (EUP path)."""
    ss = jnp.sum(x * x, axis=-1, keepdims=True)
    return x * lax.rsqrt(jnp.maximum(ss, _EPS * _EPS))


# ----------------------------------------------------------------------------
# Fused forward kernel (one batch block per grid step)
# ----------------------------------------------------------------------------
def _fused_forward_kernel(vt_ref, txt_ref, vcon_ref, ncon_ref,
                          txtn_ref, imf_ref, wt_ref, topk_ref, *, t_real):
    # vt_ref:   (B, Tp, D) raw visual tokens (CLS row 0, zero-padded to Tp)
    # txt_ref:  (B, 1, D)  raw text embedding
    # vcon_ref: (C, D)     normalized visual concepts, bf16 (shared)
    # ncon_ref: (C, D)     normalized textual concept embeddings, f32 (shared)
    # txtn_ref: (B, 1, D)  normalized text features
    # imf_ref:  (B, 1, D)  PACL image features
    # wt_ref:   (B, 2K, D) packed weighted tokens (rows [0,K)=+s, [K,2K)=-s)
    # topk_ref: (B, K)     int32 top-k concept indices (similarity order)
    B, Tp, D = vt_ref.shape
    C = ncon_ref.shape[0]
    K = topk_ref.shape[1]

    # --- batched L2 normalization (CLS kept in place; masked, never sliced)
    vt_n = _norm_rows(vt_ref[...])                                  # (B, Tp, D) f32
    txt_n = _norm_rows(txt_ref[...])                                # (B, 1, D)  f32
    txtn_ref[...] = txt_n

    # --- PACL pooling, batched: (B, 1, Tp) text->patch attention, exact softmax
    tpos = lax.broadcasted_iota(jnp.int32, (1, Tp), 1)
    pad_or_cls = (tpos == 0) | (tpos >= t_real)                     # (1, Tp) bool
    t2p = jnp.einsum('bqd,btd->bqt', txt_n, vt_n,
                     preferred_element_type=jnp.float32)            # (B, 1, Tp)
    t2p = jnp.where(pad_or_cls.reshape(1, 1, Tp), _NEG, t2p)
    t2p = t2p - jnp.max(t2p, axis=-1, keepdims=True)
    e = jnp.exp(t2p)
    w = e / jnp.sum(e, axis=-1, keepdims=True)                      # exact (feeds top-k)
    imf = _norm_rows(jnp.einsum('bqt,btd->bqd', w, vt_n,
                                preferred_element_type=jnp.float32))  # (B, 1, D)
    imf_ref[...] = imf

    # --- concept similarities, batched across B: one table stream, M = B rows.
    #     (lowered as a transposed-RHS matmul; no in-kernel table transpose)
    sims = jnp.einsum('bd,cd->bc', imf[:, 0, :], ncon_ref[...],
                      preferred_element_type=jnp.float32)           # (B, C) f32

    # --- in-kernel top-K: K iterative argmax passes; indices emitted directly
    c_iota = lax.broadcasted_iota(jnp.int32, (B, C), 1)
    rank = jnp.full((B, C), K, dtype=jnp.int32)
    work = sims
    idx_cols = []
    for k in range(K):                                              # K static -> unrolled
        m = jnp.max(work, axis=-1, keepdims=True)                   # (B, 1)
        first = jnp.min(jnp.where(work >= m, c_iota, C),
                        axis=-1, keepdims=True)                     # lowest-index tie-break
        sel = c_iota == first                                       # (B, C) one-hot mask
        rank = jnp.where(sel, k, rank)
        work = jnp.where(sel, _NEG, work)
        idx_cols.append(first)
    topk_ref[...] = jnp.concatenate(idx_cols, axis=1)               # (B, K) int32

    # --- gather all B*K visual-concept rows with ONE bf16 one-hot matmul
    #     (exact row extraction: 0/1 one-hot x bf16 rows, f32 accumulation).
    # TODO(synk): replace with direct per-row DMAs from HBM at production C.
    k_iota = lax.broadcasted_iota(jnp.int32, (K, C), 0)
    oh_list = [(rank[b:b + 1, :] == k_iota).astype(jnp.float32) for b in range(B)]
    onehot = jnp.concatenate(oh_list, axis=0)                       # (B*K, C)
    vc_all = jnp.dot(onehot.astype(jnp.bfloat16), vcon_ref[...],
                     preferred_element_type=jnp.float32)            # (B*K, D)

    # --- weighted tokens: per-image tail over the batch block.
    #     Only the +s half goes through the MXU; the -s half is a negation.
    vt_bf = vt_n.astype(jnp.bfloat16)                               # (B, Tp, D)
    tpos2 = lax.broadcasted_iota(jnp.int32, (2 * K, Tp), 1)
    pad_or_cls2 = (tpos2 == 0) | (tpos2 >= t_real)                  # (2K, Tp) bool
    for b in range(B):                                              # B static -> unrolled
        vt_b = vt_bf[b]                                             # (Tp, D) bf16
        vc_b = vc_all[b * K:(b + 1) * K, :].astype(jnp.bfloat16)    # (K, D)  bf16
        s_pos = jnp.einsum('kd,td->kt', vc_b, vt_b,
                           preferred_element_type=jnp.float32)      # (K, Tp)
        s2 = jnp.concatenate([s_pos, -s_pos], axis=0)               # (2K, Tp)
        s2 = jnp.where(pad_or_cls2, _NEG, s2)
        s2 = s2 - jnp.max(s2, axis=-1, keepdims=True)
        e2 = jnp.exp(s2)
        p2 = e2 * pl.reciprocal(jnp.sum(e2, axis=-1, keepdims=True), approx=True)
        wtok = jnp.dot(p2.astype(jnp.bfloat16), vt_b,
                       preferred_element_type=jnp.float32)          # (2K, D)
        wt_ref[b] = _norm_rows(wtok)


def _fused_call(vt_pad, txt3, vcon_bf16, ncon_f32, n_tokens, t_real, b_blk=None):
    B, Tp, D = vt_pad.shape
    C = ncon_f32.shape[0]
    K = n_tokens
    if b_blk is None:
        b_blk = B                       # whole (small) batch in one grid step
    kernel = functools.partial(_fused_forward_kernel, t_real=t_real)
    return pl.pallas_call(
        kernel,
        out_shape=(
            jax.ShapeDtypeStruct((B, 1, D), jnp.float32),       # text_features
            jax.ShapeDtypeStruct((B, 1, D), jnp.float32),       # image_features
            jax.ShapeDtypeStruct((B, 2 * K, D), jnp.float32),   # packed weighted tokens
            jax.ShapeDtypeStruct((B, K), jnp.int32),            # top-k indices
        ),
        grid=(pl.cdiv(B, b_blk),),
        in_specs=[
            pl.BlockSpec((b_blk, Tp, D), lambda i: (i, 0, 0)),
            pl.BlockSpec((b_blk, 1, D), lambda i: (i, 0, 0)),
            pl.BlockSpec((C, D), lambda i: (0, 0)),             # bf16 visual concepts
            pl.BlockSpec((C, D), lambda i: (0, 0)),             # f32 textual concepts
        ],
        out_specs=(
            pl.BlockSpec((b_blk, 1, D), lambda i: (i, 0, 0)),
            pl.BlockSpec((b_blk, 1, D), lambda i: (i, 0, 0)),
            pl.BlockSpec((b_blk, 2 * K, D), lambda i: (i, 0, 0)),
            pl.BlockSpec((b_blk, K), lambda i: (i, 0)),
        ),
        compiler_params=pltpu.CompilerParams(
            dimension_semantics=("parallel",),
            vmem_limit_bytes=64 * 1024 * 1024),
    )(vt_pad, txt3, vcon_bf16, ncon_f32)


# ----------------------------------------------------------------------------
# forward (image_features_type='pacl', match_type='textual')
# ----------------------------------------------------------------------------
@functools.partial(jax.jit, static_argnames=("n_tokens",))
def contextual_clip_forward(visual_tokens_raw, text_embed_raw,
                            visual_concepts, concepts_embeddings_normed,
                            logit_scale_param, n_tokens=4):
    # TODO(synk): the ViT trunk and the CLIP text transformer are external
    # checkpoints; their raw outputs are taken as inputs here.
    B, T, D = visual_tokens_raw.shape
    K = n_tokens

    # Pad the token axis to a multiple of 8 (sublane alignment); the padded
    # zero rows are masked out of both softmaxes inside the kernel.
    T_pad = ((T + 7) // 8) * 8
    vt = visual_tokens_raw
    if T_pad != T:
        vt = jnp.pad(vt, ((0, 0), (0, T_pad - T), (0, 0)))

    txt_n, imf, wt_packed, topk_indices = _fused_call(
        vt, text_embed_raw[:, None, :],
        visual_concepts.astype(jnp.bfloat16),     # bf16: only feeds the bf16 path
        concepts_embeddings_normed,               # f32: keeps top-k bit-exact
        K, T)

    # Unpack the sublane-full (B, 2K, D) weighted tokens to (2, B, K, D).
    weighted_tokens = jnp.transpose(wt_packed.reshape(B, 2, K, D), (1, 0, 2, 3))

    # TODO(synk): stand-in for model.encode_text(concepts_tokens[topk], normalize=True)
    textual_concepts = concepts_embeddings_normed[topk_indices]     # (B, K, D)

    return {
        "text_features": txt_n[:, 0],
        "image_features": imf[:, 0],
        "visual_concepts": weighted_tokens,          # (2, B, K, D)
        "textual_concepts": textual_concepts,
        "logit_scale": jnp.exp(logit_scale_param),
        "topk_indices": topk_indices,
        "concepts_embeddings_normed": concepts_embeddings_normed,
    }


# ----------------------------------------------------------------------------
# pure-JAX reference (for correctness check)
# ----------------------------------------------------------------------------
def _eps_normalize(x, axis=-1, eps=1e-12):
    n = jnp.sqrt(jnp.sum(x * x, axis=axis, keepdims=True))
    return x / jnp.maximum(n, eps)


def reference_forward(visual_tokens_raw, text_embed_raw, visual_concepts,
                      concepts_embeddings_normed, n_tokens):
    vt_n = _eps_normalize(visual_tokens_raw)
    txt_n = _eps_normalize(text_embed_raw)
    patches = vt_n[:, 1:]
    t2p = jnp.einsum('bd,bnd->bn', txt_n, patches)
    t2p = jax.nn.softmax(t2p, axis=-1)
    imf = _eps_normalize(jnp.einsum('bnd,bn->bd', patches, t2p))
    sim = imf @ concepts_embeddings_normed.T
    _, idx = jax.lax.top_k(sim, n_tokens)
    vc = visual_concepts[idx]
    s = jnp.einsum('bnd,bkd->bkn', patches, vc)
    s = jnp.stack([s, -s], axis=0)
    p = jax.nn.softmax(s, axis=-1)
    wt = _eps_normalize(jnp.einsum('bnd,sbkn->sbkd', patches, p))
    return vt_n, txt_n, imf, sim, idx, wt


# ----------------------------------------------------------------------------
# main
# ----------------------------------------------------------------------------
if __name__ == "__main__":
    B, N, D, C, K = 2, 16, 128, 128, 4     # batch, patches, dim, concepts, n_tokens

    key = jax.random.PRNGKey(0)
    k_vt, k_txt, k_vc, k_ce = jax.random.split(key, 4)

    # Stand-ins for backbone outputs.
    visual_tokens_raw = jax.random.normal(k_vt, (B, 1 + N, D), dtype=jnp.float32)
    text_embed_raw = jax.random.normal(k_txt, (B, D), dtype=jnp.float32)

    # Deterministic "parameters" (shapes from __init__ / embed_concepts).
    visual_concepts = _eps_normalize(
        jax.random.normal(k_vc, (C, D), dtype=jnp.float32))
    concepts_embeddings_normed = _eps_normalize(
        jax.random.normal(k_ce, (C, D), dtype=jnp.float32))
    logit_scale_param = jnp.asarray(jnp.log(1.0 / 0.07), dtype=jnp.float32)

    out = contextual_clip_forward(
        visual_tokens_raw, text_embed_raw, visual_concepts,
        concepts_embeddings_normed, logit_scale_param, n_tokens=K)
    out = jax.block_until_ready(out)

    # Sanity-check against a pure-JAX f32 reference.
    vt_n_r, txt_r, imf_r, sim_r, idx_r, wt_r = reference_forward(
        visual_tokens_raw, text_embed_raw, visual_concepts,
        concepts_embeddings_normed, K)
    assert jnp.allclose(out["text_features"], txt_r, rtol=1e-4, atol=1e-4)
    assert jnp.allclose(out["image_features"], imf_r, rtol=1e-4, atol=1e-4)
    assert jnp.array_equal(out["topk_indices"], idx_r)
    # weighted tokens use bf16 MXU operands + approx reciprocal -> looser tol
    assert jnp.allclose(out["visual_concepts"], wt_r, rtol=2e-2, atol=2e-2)
    assert jnp.allclose(out["textual_concepts"],
                        concepts_embeddings_normed[idx_r], rtol=1e-4, atol=1e-4)

    print("KERNEL_OK")
</pallas_src>

<mosaic_0001>
module attributes {stable_mosaic.version = 11 : i64} {
  func.func @_fused_forward_kernel(%arg0: i32, %arg1: memref<2x24x128xf32, #tpu.memory_space<vmem>>, %arg2: memref<2x1x128xf32, #tpu.memory_space<vmem>>, %arg3: memref<128x128xbf16, #tpu.memory_space<vmem>>, %arg4: memref<128x128xf32, #tpu.memory_space<vmem>>, %arg5: memref<2x1x128xf32, #tpu.memory_space<vmem>>, %arg6: memref<2x1x128xf32, #tpu.memory_space<vmem>>, %arg7: memref<2x8x128xf32, #tpu.memory_space<vmem>>, %arg8: memref<2x4xi32, #tpu.memory_space<vmem>>) attributes {dimension_semantics = [#tpu.dimension_semantics<parallel>], iteration_bounds = array<i64: 1>, scalar_prefetch = 0 : i64, scratch_operands = 0 : i64, tpu.core_type = #tpu.core_type<tc>, window_params = [{transform_indices = @transform_0, window_bounds = array<i64: 2, 24, 128>}, {transform_indices = @transform_1, window_bounds = array<i64: 2, 1, 128>}, {pipeline_mode = #tpu.pipeline_mode<synchronous>, transform_indices = @transform_2, window_bounds = array<i64: 128, 128>}, {pipeline_mode = #tpu.pipeline_mode<synchronous>, transform_indices = @transform_3, window_bounds = array<i64: 128, 128>}, {transform_indices = @transform_4, window_bounds = array<i64: 2, 1, 128>}, {transform_indices = @transform_5, window_bounds = array<i64: 2, 1, 128>}, {transform_indices = @transform_6, window_bounds = array<i64: 2, 8, 128>}, {transform_indices = @transform_7, window_bounds = array<i64: 2, 4>}]} {
    %c0 = arith.constant 0 : index
    %c0_0 = arith.constant 0 : index
    %c0_1 = arith.constant 0 : index
    %0 = vector.load %arg1[%c0, %c0_0, %c0_1] : memref<2x24x128xf32, #tpu.memory_space<vmem>>, vector<2x24x128xf32>
    %1 = arith.mulf %0, %0 : vector<2x24x128xf32>
    %cst = arith.constant dense<0.000000e+00> : vector<2x24xf32>
    %2 = vector.multi_reduction <add>, %1, %cst [2] : vector<2x24x128xf32> to vector<2x24xf32>
    %3 = vector.shape_cast %2 : vector<2x24xf32> to vector<2x24x1xf32>
    %cst_2 = arith.constant 1.000000e-24 : f32
    %4 = vector.broadcast %cst_2 : f32 to vector<2x24x1xf32>
    %5 = arith.maximumf %3, %4 : vector<2x24x1xf32>
    %6 = math.rsqrt %5 : vector<2x24x1xf32>
    %7 = vector.broadcast %6 : vector<2x24x1xf32> to vector<2x24x128xf32>
    %8 = arith.mulf %0, %7 : vector<2x24x128xf32>
    %c0_3 = arith.constant 0 : index
    %c0_4 = arith.constant 0 : index
    %c0_5 = arith.constant 0 : index
    %9 = vector.load %arg2[%c0_3, %c0_4, %c0_5] : memref<2x1x128xf32, #tpu.memory_space<vmem>>, vector<2x1x128xf32>
    %10 = arith.mulf %9, %9 : vector<2x1x128xf32>
    %cst_6 = arith.constant dense<0.000000e+00> : vector<2x1xf32>
    %11 = vector.multi_reduction <add>, %10, %cst_6 [2] : vector<2x1x128xf32> to vector<2x1xf32>
    %12 = vector.shape_cast %11 : vector<2x1xf32> to vector<2x1x1xf32>
    %cst_7 = arith.constant 1.000000e-24 : f32
    %13 = vector.broadcast %cst_7 : f32 to vector<2x1x1xf32>
    %14 = arith.maximumf %12, %13 : vector<2x1x1xf32>
    %15 = math.rsqrt %14 : vector<2x1x1xf32>
    %16 = vector.broadcast %15 : vector<2x1x1xf32> to vector<2x1x128xf32>
    %17 = arith.mulf %9, %16 : vector<2x1x128xf32>
    %c0_8 = arith.constant 0 : index
    %c0_9 = arith.constant 0 : index
    %c0_10 = arith.constant 0 : index
    %18 = vector.load %arg5[%c0_8, %c0_9, %c0_10] : memref<2x1x128xf32, #tpu.memory_space<vmem>>, vector<2x1x128xf32>
    tpu.vector_store %arg5[%c0_8, %c0_9, %c0_10], %17 {strides = array<i32>} : memref<2x1x128xf32, #tpu.memory_space<vmem>>, vector<2x1x128xf32>,
    %19 = tpu.iota {dimensions = array<i32: 1>} : vector<1x24xi32>
    %c0_i32 = arith.constant 0 : i32
    %20 = vector.broadcast %c0_i32 : i32 to vector<1x24xi32>
    %21 = arith.cmpi eq, %19, %20 : vector<1x24xi32>
    %c17_i32 = arith.constant 17 : i32
    %22 = vector.broadcast %c17_i32 : i32 to vector<1x24xi32>
    %23 = arith.cmpi sge, %19, %22 : vector<1x24xi32>
    %24 = arith.ori %21, %23 : vector<1x24xi1>
    "tpu.trace_start"() <{level = 10 : i32, message = "bqd,btd->bqt"}> : () -> ()
    %cst_11 = arith.constant dense<0.000000e+00> : vector<2x1x24xf32>
    %25 = tpu.matmul %17, %8, %cst_11 {dimension_numbers = #tpu.dot_dimension_numbers<[2], [2], [1], [1], [0, 0, 0, 1, 1, 1], [0], [0]>} : vector<2x1x128xf32>, vector<2x24x128xf32>, vector<2x1x24xf32> -> vector<2x1x24xf32>
    "tpu.trace_stop"() : () -> ()
    %26 = vector.shape_cast %24 : vector<1x24xi1> to vector<1x1x24xi1>
    %cst_12 = arith.constant -1.000000e+30 : f32
    %27 = vector.shape_cast %26 : vector<1x1x24xi1> to vector<1x1x24xi1>
    %28 = vector.broadcast %27 : vector<1x1x24xi1> to vector<2x1x24xi1>
    %29 = vector.broadcast %cst_12 : f32 to vector<2x1x24xf32>
    %30 = arith.select %28, %29, %25 : vector<2x1x24xi1>, vector<2x1x24xf32>
    %cst_13 = arith.constant dense<0xFF800000> : vector<2x1xf32>
    %31 = vector.multi_reduction <maximumf>, %30, %cst_13 [2] : vector<2x1x24xf32> to vector<2x1xf32>
    %32 = vector.shape_cast %31 : vector<2x1xf32> to vector<2x1x1xf32>
    %33 = vector.broadcast %32 : vector<2x1x1xf32> to vector<2x1x24xf32>
    %34 = arith.subf %30, %33 : vector<2x1x24xf32>
    %35 = math.exp %34 : vector<2x1x24xf32>
    %cst_14 = arith.constant dense<0.000000e+00> : vector<2x1xf32>
    %36 = vector.multi_reduction <add>, %35, %cst_14 [2] : vector<2x1x24xf32> to vector<2x1xf32>
    %37 = vector.shape_cast %36 : vector<2x1xf32> to vector<2x1x1xf32>
    %38 = vector.broadcast %37 : vector<2x1x1xf32> to vector<2x1x24xf32>
    %39 = arith.divf %35, %38 : vector<2x1x24xf32>
    "tpu.trace_start"() <{level = 10 : i32, message = "bqt,btd->bqd"}> : () -> ()
    %cst_15 = arith.constant dense<0.000000e+00> : vector<2x1x128xf32>
    %40 = tpu.matmul %39, %8, %cst_15 {dimension_numbers = #tpu.dot_dimension_numbers<[2], [1], [1], [2], [0, 0, 0, 1, 1, 2], [0], [0]>} : vector<2x1x24xf32>, vector<2x24x128xf32>, vector<2x1x128xf32> -> vector<2x1x128xf32>
    "tpu.trace_stop"() : () -> ()
    %41 = arith.mulf %40, %40 : vector<2x1x128xf32>
    %cst_16 = arith.constant dense<0.000000e+00> : vector<2x1xf32>
    %42 = vector.multi_reduction <add>, %41, %cst_16 [2] : vector<2x1x128xf32> to vector<2x1xf32>
    %43 = vector.shape_cast %42 : vector<2x1xf32> to vector<2x1x1xf32>
    %cst_17 = arith.constant 1.000000e-24 : f32
    %44 = vector.broadcast %cst_17 : f32 to vector<2x1x1xf32>
    %45 = arith.maximumf %43, %44 : vector<2x1x1xf32>
    %46 = math.rsqrt %45 : vector<2x1x1xf32>
    %47 = vector.broadcast %46 : vector<2x1x1xf32> to vector<2x1x128xf32>
    %48 = arith.mulf %40, %47 : vector<2x1x128xf32>
    %c0_18 = arith.constant 0 : index
    %c0_19 = arith.constant 0 : index
    %c0_20 = arith.constant 0 : index
    %49 = vector.load %arg6[%c0_18, %c0_19, %c0_20] : memref<2x1x128xf32, #tpu.memory_space<vmem>>, vector<2x1x128xf32>
    tpu.vector_store %arg6[%c0_18, %c0_19, %c0_20], %48 {strides = array<i32>} : memref<2x1x128xf32, #tpu.memory_space<vmem>>, vector<2x1x128xf32>,
    %50 = vector.shape_cast %48 : vector<2x1x128xf32> to vector<2x128xf32>
    %c0_21 = arith.constant 0 : index
    %c0_22 = arith.constant 0 : index
    %51 = vector.load %arg4[%c0_21, %c0_22] : memref<128x128xf32, #tpu.memory_space<vmem>>, vector<128x128xf32>
    "tpu.trace_start"() <{level = 10 : i32, message = "bd,cd->bc"}> : () -> ()
    %cst_23 = arith.constant dense<0.000000e+00> : vector<2x128xf32>
    %52 = tpu.matmul %50, %51, %cst_23 {dimension_numbers = #tpu.dot_dimension_numbers<[1], [1], [0], [0], [0, 0, 1, 0], [], []>} : vector<2x128xf32>, vector<128x128xf32>, vector<2x128xf32> -> vector<2x128xf32>
    "tpu.trace_stop"() : () -> ()
    %53 = tpu.iota {dimensions = array<i32: 1>} : vector<2x128xi32>
    %c4_i32 = arith.constant 4 : i32
    %54 = vector.broadcast %c4_i32 : i32 to vector<2x128xi32>
    %cst_24 = arith.constant dense<0xFF800000> : vector<2xf32>
    %55 = vector.multi_reduction <maximumf>, %52, %cst_24 [1] : vector<2x128xf32> to vector<2xf32>
    %56 = vector.shape_cast %55 : vector<2xf32> to vector<2x1xf32>
    %57 = vector.broadcast %56 : vector<2x1xf32> to vector<2x128xf32>
    %58 = arith.cmpf oge, %52, %57 : vector<2x128xf32>
    %c128_i32 = arith.constant 128 : i32
    %59 = vector.broadcast %c128_i32 : i32 to vector<2x128xi32>
    %60 = arith.select %58, %53, %59 : vector<2x128xi1>, vector<2x128xi32>
    %cst_25 = arith.constant dense<2147483647> : vector<2xi32>
    %61 = vector.multi_reduction <minsi>, %60, %cst_25 [1] : vector<2x128xi32> to vector<2xi32>
    %62 = vector.shape_cast %61 : vector<2xi32> to vector<2x1xi32>
    %63 = vector.broadcast %62 : vector<2x1xi32> to vector<2x128xi32>
    %64 = arith.cmpi eq, %53, %63 : vector<2x128xi32>
    %c0_i32_26 = arith.constant 0 : i32
    %65 = vector.broadcast %c0_i32_26 : i32 to vector<2x128xi32>
    %66 = arith.select %64, %65, %54 : vector<2x128xi1>, vector<2x128xi32>
    %cst_27 = arith.constant -1.000000e+30 : f32
    %67 = vector.broadcast %cst_27 : f32 to vector<2x128xf32>
    %68 = arith.select %64, %67, %52 : vector<2x128xi1>, vector<2x128xf32>
    %cst_28 = arith.constant dense<0xFF800000> : vector<2xf32>
    %69 = vector.multi_reduction <maximumf>, %68, %cst_28 [1] : vector<2x128xf32> to vector<2xf32>
    %70 = vector.shape_cast %69 : vector<2xf32> to vector<2x1xf32>
    %71 = vector.broadcast %70 : vector<2x1xf32> to vector<2x128xf32>
    %72 = arith.cmpf oge, %68, %71 : vector<2x128xf32>
    %c128_i32_29 = arith.constant 128 : i32
    %73 = vector.broadcast %c128_i32_29 : i32 to vector<2x128xi32>
    %74 = arith.select %72, %53, %73 : vector<2x128xi1>, vector<2x128xi32>
    %cst_30 = arith.constant dense<2147483647> : vector<2xi32>
    %75 = vector.multi_reduction <minsi>, %74, %cst_30 [1] : vector<2x128xi32> to vector<2xi32>
    %76 = vector.shape_cast %75 : vector<2xi32> to vector<2x1xi32>
    %77 = vector.broadcast %76 : vector<2x1xi32> to vector<2x128xi32>
    %78 = arith.cmpi eq, %53, %77 : vector<2x128xi32>
    %c1_i32 = arith.constant 1 : i32
    %79 = vector.broadcast %c1_i32 : i32 to vector<2x128xi32>
    %80 = arith.select %78, %79, %66 : vector<2x128xi1>, vector<2x128xi32>
    %cst_31 = arith.constant -1.000000e+30 : f32
    %81 = vector.broadcast %cst_31 : f32 to vector<2x128xf32>
    %82 = arith.select %78, %81, %68 : vector<2x128xi1>, vector<2x128xf32>
    %cst_32 = arith.constant dense<0xFF800000> : vector<2xf32>
    %83 = vector.multi_reduction <maximumf>, %82, %cst_32 [1] : vector<2x128xf32> to vector<2xf32>
    %84 = vector.shape_cast %83 : vector<2xf32> to vector<2x1xf32>
    %85 = vector.broadcast %84 : vector<2x1xf32> to vector<2x128xf32>
    %86 = arith.cmpf oge, %82, %85 : vector<2x128xf32>
    %c128_i32_33 = arith.constant 128 : i32
    %87 = vector.broadcast %c128_i32_33 : i32 to vector<2x128xi32>
    %88 = arith.select %86, %53, %87 : vector<2x128xi1>, vector<2x128xi32>
    %cst_34 = arith.constant dense<2147483647> : vector<2xi32>
    %89 = vector.multi_reduction <minsi>, %88, %cst_34 [1] : vector<2x128xi32> to vector<2xi32>
    %90 = vector.shape_cast %89 : vector<2xi32> to vector<2x1xi32>
    %91 = vector.broadcast %90 : vector<2x1xi32> to vector<2x128xi32>
    %92 = arith.cmpi eq, %53, %91 : vector<2x128xi32>
    %c2_i32 = arith.constant 2 : i32
    %93 = vector.broadcast %c2_i32 : i32 to vector<2x128xi32>
    %94 = arith.select %92, %93, %80 : vector<2x128xi1>, vector<2x128xi32>
    %cst_35 = arith.constant -1.000000e+30 : f32
    %95 = vector.broadcast %cst_35 : f32 to vector<2x128xf32>
    %96 = arith.select %92, %95, %82 : vector<2x128xi1>, vector<2x128xf32>
    %cst_36 = arith.constant dense<0xFF800000> : vector<2xf32>
    %97 = vector.multi_reduction <maximumf>, %96, %cst_36 [1] : vector<2x128xf32> to vector<2xf32>
    %98 = vector.shape_cast %97 : vector<2xf32> to vector<2x1xf32>
    %99 = vector.broadcast %98 : vector<2x1xf32> to vector<2x128xf32>
    %100 = arith.cmpf oge, %96, %99 : vector<2x128xf32>
    %c128_i32_37 = arith.constant 128 : i32
    %101 = vector.broadcast %c128_i32_37 : i32 to vector<2x128xi32>
    %102 = arith.select %100, %53, %101 : vector<2x128xi1>, vector<2x128xi32>
    %cst_38 = arith.constant dense<2147483647> : vector<2xi32>
    %103 = vector.multi_reduction <minsi>, %102, %cst_38 [1] : vector<2x128xi32> to vector<2xi32>
    %104 = vector.shape_cast %103 : vector<2xi32> to vector<2x1xi32>
    %105 = vector.broadcast %104 : vector<2x1xi32> to vector<2x128xi32>
    %106 = arith.cmpi eq, %53, %105 : vector<2x128xi32>
    %c3_i32 = arith.constant 3 : i32
    %107 = vector.broadcast %c3_i32 : i32 to vector<2x128xi32>
    %108 = arith.select %106, %107, %94 : vector<2x128xi1>, vector<2x128xi32>
    %109 = tpu.concatenate %62, %76, %90, %104 in 1 : vector<2x1xi32>, vector<2x1xi32>, vector<2x1xi32>, vector<2x1xi32> -> vector<2x4xi32>
    %c0_39 = arith.constant 0 : index
    %c0_40 = arith.constant 0 : index
    %110 = vector.load %arg8[%c0_39, %c0_40] : memref<2x4xi32, #tpu.memory_space<vmem>>, vector<2x4xi32>
    tpu.vector_store %arg8[%c0_39, %c0_40], %109 {strides = array<i32>} : memref<2x4xi32, #tpu.memory_space<vmem>>, vector<2x4xi32>,
    %111 = tpu.iota {dimensions = array<i32: 0>} : vector<4x128xi32>
    %112 = vector.extract_strided_slice %108 {offsets = [0, 0], sizes = [1, 128], strides = [1, 1]} : vector<2x128xi32> to vector<1x128xi32>
    %113 = vector.broadcast %112 : vector<1x128xi32> to vector<4x128xi32>
    %114 = arith.cmpi eq, %113, %111 : vector<4x128xi32>
    %115 = arith.extui %114 : vector<4x128xi1> to vector<4x128xi32>
    %116 = arith.sitofp %115 : vector<4x128xi32> to vector<4x128xf32>
    %117 = vector.extract_strided_slice %108 {offsets = [1, 0], sizes = [1, 128], strides = [1, 1]} : vector<2x128xi32> to vector<1x128xi32>
    %118 = vector.broadcast %117 : vector<1x128xi32> to vector<4x128xi32>
    %119 = arith.cmpi eq, %118, %111 : vector<4x128xi32>
    %120 = arith.extui %119 : vector<4x128xi1> to vector<4x128xi32>
    %121 = arith.sitofp %120 : vector<4x128xi32> to vector<4x128xf32>
    %122 = tpu.concatenate %116, %121 in 0 : vector<4x128xf32>, vector<4x128xf32> -> vector<8x128xf32>
    %123 = arith.truncf %122 : vector<8x128xf32> to vector<8x128xbf16>
    %c0_41 = arith.constant 0 : index
    %c0_42 = arith.constant 0 : index
    %124 = vector.load %arg3[%c0_41, %c0_42] : memref<128x128xbf16, #tpu.memory_space<vmem>>, vector<128x128xbf16>
    %cst_43 = arith.constant dense<0.000000e+00> : vector<8x128xf32>
    %125 = tpu.matmul %123, %124, %cst_43 {dimension_numbers = #tpu.dot_dimension_numbers<[1], [0], [0], [1], [0, 0, 1, 1], [], []>} : vector<8x128xbf16>, vector<128x128xbf16>, vector<8x128xf32> -> vector<8x128xf32>
    %126 = arith.truncf %8 : vector<2x24x128xf32> to vector<2x24x128xbf16>
    %127 = tpu.iota {dimensions = array<i32: 1>} : vector<8x24xi32>
    %c0_i32_44 = arith.constant 0 : i32
    %128 = vector.broadcast %c0_i32_44 : i32 to vector<8x24xi32>
    %129 = arith.cmpi eq, %127, %128 : vector<8x24xi32>
    %c17_i32_45 = arith.constant 17 : i32
    %130 = vector.broadcast %c17_i32_45 : i32 to vector<8x24xi32>
    %131 = arith.cmpi sge, %127, %130 : vector<8x24xi32>
    %132 = arith.ori %129, %131 : vector<8x24xi1>
    %133 = vector.extract_strided_slice %126 {offsets = [0, 0, 0], sizes = [1, 24, 128], strides = [1, 1, 1]} : vector<2x24x128xbf16> to vector<1x24x128xbf16>
    %134 = vector.shape_cast %133 : vector<1x24x128xbf16> to vector<24x128xbf16>
    %135 = vector.extract_strided_slice %125 {offsets = [0, 0], sizes = [4, 128], strides = [1, 1]} : vector<8x128xf32> to vector<4x128xf32>
    %136 = arith.truncf %135 : vector<4x128xf32> to vector<4x128xbf16>
    "tpu.trace_start"() <{level = 10 : i32, message = "kd,td->kt"}> : () -> ()
    %cst_46 = arith.constant dense<0.000000e+00> : vector<4x24xf32>
    %137 = tpu.matmul %136, %134, %cst_46 {dimension_numbers = #tpu.dot_dimension_numbers<[1], [1], [0], [0], [0, 0, 1, 0], [], []>} : vector<4x128xbf16>, vector<24x128xbf16>, vector<4x24xf32> -> vector<4x24xf32>
    "tpu.trace_stop"() : () -> ()
    %cst_47 = arith.constant 0.000000e+00 : f32
    %138 = vector.broadcast %cst_47 : f32 to vector<4x24xf32>
    %139 = arith.subf %138, %137 : vector<4x24xf32>
    %140 = tpu.concatenate %137, %139 in 0 : vector<4x24xf32>, vector<4x24xf32> -> vector<8x24xf32>
    %cst_48 = arith.constant -1.000000e+30 : f32
    %141 = vector.broadcast %cst_48 : f32 to vector<8x24xf32>
    %142 = arith.select %132, %141, %140 : vector<8x24xi1>, vector<8x24xf32>
    %cst_49 = arith.constant dense<0xFF800000> : vector<8xf32>
    %143 = vector.multi_reduction <maximumf>, %142, %cst_49 [1] : vector<8x24xf32> to vector<8xf32>
    %144 = vector.shape_cast %143 : vector<8xf32> to vector<8x1xf32>
    %145 = vector.broadcast %144 : vector<8x1xf32> to vector<8x24xf32>
    %146 = arith.subf %142, %145 : vector<8x24xf32>
    %147 = math.exp %146 : vector<8x24xf32>
    %cst_50 = arith.constant dense<0.000000e+00> : vector<8xf32>
    %148 = vector.multi_reduction <add>, %147, %cst_50 [1] : vector<8x24xf32> to vector<8xf32>
    %149 = vector.shape_cast %148 : vector<8xf32> to vector<8x1xf32>
    %150 = tpu.reciprocal %149 {approx = true} : vector<8x1xf32> -> vector<8x1xf32>
    %151 = vector.broadcast %150 : vector<8x1xf32> to vector<8x24xf32>
    %152 = arith.mulf %147, %151 : vector<8x24xf32>
    %153 = arith.truncf %152 : vector<8x24xf32> to vector<8x24xbf16>
    %cst_51 = arith.constant dense<0.000000e+00> : vector<8x128xf32>
    %154 = tpu.matmul %153, %134, %cst_51 {dimension_numbers = #tpu.dot_dimension_numbers<[1], [0], [0], [1], [0, 0, 1, 1], [], []>} : vector<8x24xbf16>, vector<24x128xbf16>, vector<8x128xf32> -> vector<8x128xf32>
    %155 = arith.mulf %154, %154 : vector<8x128xf32>
    %cst_52 = arith.constant dense<0.000000e+00> : vector<8xf32>
    %156 = vector.multi_reduction <add>, %155, %cst_52 [1] : vector<8x128xf32> to vector<8xf32>
    %157 = vector.shape_cast %156 : vector<8xf32> to vector<8x1xf32>
    %cst_53 = arith.constant 1.000000e-24 : f32
    %158 = vector.broadcast %cst_53 : f32 to vector<8x1xf32>
    %159 = arith.maximumf %157, %158 : vector<8x1xf32>
    %160 = math.rsqrt %159 : vector<8x1xf32>
    %161 = vector.broadcast %160 : vector<8x1xf32> to vector<8x128xf32>
    %162 = arith.mulf %154, %161 : vector<8x128xf32>
    %c0_54 = arith.constant 0 : index
    %c0_55 = arith.constant 0 : index
    %c0_56 = arith.constant 0 : index
    %163 = vector.load %arg7[%c0_54, %c0_55, %c0_56] : memref<2x8x128xf32, #tpu.memory_space<vmem>>, vector<1x8x128xf32>
    %164 = vector.shape_cast %163 : vector<1x8x128xf32> to vector<8x128xf32>
    %165 = vector.shape_cast %162 : vector<8x128xf32> to vector<1x8x128xf32>
    tpu.vector_store %arg7[%c0_54, %c0_55, %c0_56], %165 {strides = array<i32>} : memref<2x8x128xf32, #tpu.memory_space<vmem>>, vector<1x8x128xf32>,
    %166 = vector.extract_strided_slice %126 {offsets = [1, 0, 0], sizes = [1, 24, 128], strides = [1, 1, 1]} : vector<2x24x128xbf16> to vector<1x24x128xbf16>
    %167 = vector.shape_cast %166 : vector<1x24x128xbf16> to vector<24x128xbf16>
    %168 = vector.extract_strided_slice %125 {offsets = [4, 0], sizes = [4, 128], strides = [1, 1]} : vector<8x128xf32> to vector<4x128xf32>
    %169 = arith.truncf %168 : vector<4x128xf32> to vector<4x128xbf16>
    "tpu.trace_start"() <{level = 10 : i32, message = "kd,td->kt"}> : () -> ()
    %cst_57 = arith.constant dense<0.000000e+00> : vector<4x24xf32>
    %170 = tpu.matmul %169, %167, %cst_57 {dimension_numbers = #tpu.dot_dimension_numbers<[1], [1], [0], [0], [0, 0, 1, 0], [], []>} : vector<4x128xbf16>, vector<24x128xbf16>, vector<4x24xf32> -> vector<4x24xf32>
    "tpu.trace_stop"() : () -> ()
    %cst_58 = arith.constant 0.000000e+00 : f32
    %171 = vector.broadcast %cst_58 : f32 to vector<4x24xf32>
    %172 = arith.subf %171, %170 : vector<4x24xf32>
    %173 = tpu.concatenate %170, %172 in 0 : vector<4x24xf32>, vector<4x24xf32> -> vector<8x24xf32>
    %cst_59 = arith.constant -1.000000e+30 : f32
    %174 = vector.broadcast %cst_59 : f32 to vector<8x24xf32>
    %175 = arith.select %132, %174, %173 : vector<8x24xi1>, vector<8x24xf32>
    %cst_60 = arith.constant dense<0xFF800000> : vector<8xf32>
    %176 = vector.multi_reduction <maximumf>, %175, %cst_60 [1] : vector<8x24xf32> to vector<8xf32>
    %177 = vector.shape_cast %176 : vector<8xf32> to vector<8x1xf32>
    %178 = vector.broadcast %177 : vector<8x1xf32> to vector<8x24xf32>
    %179 = arith.subf %175, %178 : vector<8x24xf32>
    %180 = math.exp %179 : vector<8x24xf32>
    %cst_61 = arith.constant dense<0.000000e+00> : vector<8xf32>
    %181 = vector.multi_reduction <add>, %180, %cst_61 [1] : vector<8x24xf32> to vector<8xf32>
    %182 = vector.shape_cast %181 : vector<8xf32> to vector<8x1xf32>
    %183 = tpu.reciprocal %182 {approx = true} : vector<8x1xf32> -> vector<8x1xf32>
    %184 = vector.broadcast %183 : vector<8x1xf32> to vector<8x24xf32>
    %185 = arith.mulf %180, %184 : vector<8x24xf32>
    %186 = arith.truncf %185 : vector<8x24xf32> to vector<8x24xbf16>
    %cst_62 = arith.constant dense<0.000000e+00> : vector<8x128xf32>
    %187 = tpu.matmul %186, %167, %cst_62 {dimension_numbers = #tpu.dot_dimension_numbers<[1], [0], [0], [1], [0, 0, 1, 1], [], []>} : vector<8x24xbf16>, vector<24x128xbf16>, vector<8x128xf32> -> vector<8x128xf32>
    %188 = arith.mulf %187, %187 : vector<8x128xf32>
    %cst_63 = arith.constant dense<0.000000e+00> : vector<8xf32>
    %189 = vector.multi_reduction <add>, %188, %cst_63 [1] : vector<8x128xf32> to vector<8xf32>
    %190 = vector.shape_cast %189 : vector<8xf32> to vector<8x1xf32>
    %cst_64 = arith.constant 1.000000e-24 : f32
    %191 = vector.broadcast %cst_64 : f32 to vector<8x1xf32>
    %192 = arith.maximumf %190, %191 : vector<8x1xf32>
    %193 = math.rsqrt %192 : vector<8x1xf32>
    %194 = vector.broadcast %193 : vector<8x1xf32> to vector<8x128xf32>
    %195 = arith.mulf %187, %194 : vector<8x128xf32>
    %c1 = arith.constant 1 : index
    %c0_65 = arith.constant 0 : index
    %c0_66 = arith.constant 0 : index
    %196 = vector.load %arg7[%c1, %c0_65, %c0_66] : memref<2x8x128xf32, #tpu.memory_space<vmem>>, vector<1x8x128xf32>
    %197 = vector.shape_cast %196 : vector<1x8x128xf32> to vector<8x128xf32>
    %198 = vector.shape_cast %195 : vector<8x128xf32> to vector<1x8x128xf32>
    tpu.vector_store %arg7[%c1, %c0_65, %c0_66], %198 {strides = array<i32>} : memref<2x8x128xf32, #tpu.memory_space<vmem>>, vector<1x8x128xf32>,
    return
  }
  func.func @transform_0(%arg0: i32) -> (i32, i32, i32) {
    %c0_i32 = arith.constant 0 : i32
    %c0_i32_0 = arith.constant 0 : i32
    %c0_i32_1 = arith.constant 0 : i32
    return %arg0, %c0_i32, %c0_i32_0 : i32, i32, i32
  }
  func.func @transform_1(%arg0: i32) -> (i32, i32, i32) {
    %c0_i32 = arith.constant 0 : i32
    %c0_i32_0 = arith.constant 0 : i32
    %c0_i32_1 = arith.constant 0 : i32
    return %arg0, %c0_i32, %c0_i32_0 : i32, i32, i32
  }
  func.func @transform_2(%arg0: i32) -> (i32, i32) {
    %c0_i32 = arith.constant 0 : i32
    %c0_i32_0 = arith.constant 0 : i32
    %c0_i32_1 = arith.constant 0 : i32
    return %c0_i32, %c0_i32_0 : i32, i32
  }
  func.func @transform_3(%arg0: i32) -> (i32, i32) {
    %c0_i32 = arith.constant 0 : i32
    %c0_i32_0 = arith.constant 0 : i32
    %c0_i32_1 = arith.constant 0 : i32
    return %c0_i32, %c0_i32_0 : i32, i32
  }
  func.func @transform_4(%arg0: i32) -> (i32, i32, i32) {
    %c0_i32 = arith.constant 0 : i32
    %c0_i32_0 = arith.constant 0 : i32
    %c0_i32_1 = arith.constant 0 : i32
    return %arg0, %c0_i32, %c0_i32_0 : i32, i32, i32
  }
  func.func @transform_5(%arg0: i32) -> (i32, i32, i32) {
    %c0_i32 = arith.constant 0 : i32
    %c0_i32_0 = arith.constant 0 : i32
    %c0_i32_1 = arith.constant 0 : i32
    return %arg0, %c0_i32, %c0_i32_0 : i32, i32, i32
  }
  func.func @transform_6(%arg0: i32) -> (i32, i32, i32) {
    %c0_i32 = arith.constant 0 : i32
    %c0_i32_0 = arith.constant 0 : i32
    %c0_i32_1 = arith.constant 0 : i32
    return %arg0, %c0_i32, %c0_i32_0 : i32, i32, i32
  }
  func.func @transform_7(%arg0: i32) -> (i32, i32) {
    %c0_i32 = arith.constant 0 : i32
    %c0_i32_0 = arith.constant 0 : i32
    return %arg0, %c0_i32 : i32, i32
  }
}

</mosaic_0001>

<bundles_post_ra>
// kernel: contextual_clip_forward.1
= control target key start
LH: loop header
LB: loop body
LE: loop exit
PB: predicated region body
PF: predicated region fallthrough
CT: control target
= control target key end

     0   :  { %13 = vsyncpa [#allocation3], 0  ;;  %vm124_vm0 = vcmask 1040384   ;;  %s1239_s0 = inlined_call_operand.vmem [shape: f32[2,24,128], index: 0, kind: input, shape index: {}]   ;;  %s1240_s1 = inlined_call_operand.vmem [shape: f32[2,1,128], index: 1, kind: input, shape index: {}]   ;;  %s1241_s2 = inlined_call_operand.vmem [shape: bf16[128,128], index: 2, kind: input, shape index: {}]   ;;  %s1242_s3 = inlined_call_operand.vmem [shape: f32[128,128], index: 3, kind: input, shape index: {}]   ;;  %s1243_s4 = inlined_call_operand.hbm [shape: f32[2,1,128], index: 4, kind: output, shape index: {0}]   ;;  %s1244_s5 = inlined_call_operand.hbm [shape: f32[2,1,128], index: 5, kind: output, shape index: {1}]   ;;  %s1245_s6 = inlined_call_operand.vmem [shape: f32[2,8,128], index: 6, kind: output, shape index: {2}]   ;;  %s1246_s7 = inlined_call_operand.vmem [shape: s32[2,4], index: 7, kind: output, shape index: {3}]  }
   0x1   :  { %v972_v0 = vld [vmem:[%s1239_s0 + $0x28] sm:$0xff]  ;;  %v977_v1 = vld [vmem:[%s1239_s0 + $0x10] sm:$0xff]  ;;  %v982_v2 = vld [vmem:[%s1240_s1 + $0x1] sm:$0x1] }
   0x2   :  { %v35_v3 = vmul.f32 %v972_v0, %v972_v0  ;;  %v32_v4 = vmul.f32 %v977_v1, %v977_v1  ;;  %v123_v5 = vmul.f32 %v982_v2, %v982_v2 }
   0x3   :  { %14 = vsyncpa [#allocation5], 0  ;;  %v994_v7 = vld [vmem:[%s1239_s0 + $0x20] sm:$0xff]  ;;  %v999_v8 = vld [vmem:[%s1239_s0 + $0x18] sm:$0xff]  ;;  %s925_s17 = smov [#allocation2]   ;;  %s926_s19 = smov 16  }
   0x4   :  { %46 = vadd.xlane.f32.xlu0 %v35_v3  ;;  %40 = vadd.xlane.f32.xlu1 %v32_v4  ;;  %v128_v6 = vsel %vm124_vm0, %v123_v5, 0.0  ;;  %v1004_v9 = vld [vmem:[%s1239_s0 + $0x8] sm:$0xff]  ;;  %v34_v10 = vmul.f32 %v994_v7, %v994_v7  ;;  %v33_v11 = vmul.f32 %v999_v8, %v999_v8  ;;  %v1015_v13 = vld [vmem:[%s1240_s1] sm:$0x1]  ;;  %s740_s1 = sshll.u32 %s1243_s4, 4  ;;  %s738_s18 = sshll.u32 %s925_s17, 4  ;;  %s741_s1 = int_to_ptr.hbm [resolvable:$true] %s740_s1  ;;  %s739_s18 = int_to_ptr.vmem [resolvable:$true] %s738_s18 }
   0x5   :  { %129 = vadd.xlane.f32.xlu2 %v128_v6  ;;  %v31_v12 = vmul.f32 %v1004_v9, %v1004_v9  ;;  %v122_v14 = vmul.f32 %v1015_v13, %v1015_v13  ;;  %v1022_v15 = vld [vmem:[%s1239_s0] sm:$0xff]  ;;  %s927_s20 = smov 1   ;;  %s928_s21 = smov [#allocation4]  }
   0x6   :  { %v30_v16 = vmul.f32 %v1022_v15, %v1022_v15  ;;  %s753_s24 = sshll.u32 %s1244_s5, 4  ;;  %s754_s24 = int_to_ptr.hbm [resolvable:$true] %s753_s24 }
   0x7   :  { %v125_v17 = vsel %vm124_vm0, %v122_v14, 0.0 }
   0xc   :  { %44 = vadd.xlane.f32.xlu0 %v34_v10  ;;  %42 = vadd.xlane.f32.xlu1 %v33_v11 }
   0xd   :  { %38 = vadd.xlane.f32.xlu2 %v31_v12 }
  0x14   :  { %126 = vadd.xlane.f32.xlu1 %v125_v17  ;;  %36 = vadd.xlane.f32.xlu0 %v30_v16 }
  0x77   :  { %v47_v18 = vpop.xlane.xlu0 %46  ;;  %v41_v19 = vpop.xlane.xlu1 %40 }
  0x78   :  { %v53_v20 = vmax.f32 %v47_v18, 1e-24  ;;  %v50_v21 = vmax.f32 %v41_v19, 1e-24  ;;  %v130_v22 = vpop.xlane.xlu2 %129 }
  0x79   :  { %v132_v23 = vmax.f32 %v130_v22, 1e-24 }
  0x7a   :  { %831 = vrsqrt.f32 %v53_v20  ;;  %vm110_vm2 = vweird.f32 %v53_v20  ;;  %vm80_vm7 = vweird.f32 %v50_v21 }
  0x7b   :  { %833 = vrsqrt.f32 %v50_v21  ;;  %vm149_vm4 = vweird.f32 %v132_v23 }
  0x7c   :  { %835 = vrsqrt.f32 %v132_v23 }
  0x7f   :  { %v45_v24 = vpop.xlane.xlu0 %44  ;;  %v43_v25 = vpop.xlane.xlu1 %42 }
  0x80   :  { %v832_v26 = vpop.eup %831  ;;  %v1027_v27 = vmax.f32 %v45_v24, 1e-24  ;;  %v1029_v28 = vmax.f32 %v43_v25, 1e-24  ;;  %v39_v29 = vpop.xlane.xlu2 %38 }
  0x81   :  { %v834_v30 = vpop.eup %833  ;;  %v105_v31 = vmul.f32 %v832_v26, %v53_v20  ;;  %v1031_v32 = vmax.f32 %v39_v29, 1e-24  ;;  %vm111_vm1 = vweird.f32 %v832_v26 }
  0x82   :  { %v836_v33 = vpop.eup %835  ;;  %v75_v34 = vmul.f32 %v834_v30, %v50_v21  ;;  %837 = vrsqrt.f32 %v1027_v27  ;;  %vm81_vm3 = vweird.f32 %v834_v30  ;;  %vm112_vm5 = vmor %vm110_vm2, %vm111_vm1  ;;  %vm100_vm9 = vweird.f32 %v1027_v27 }
  0x83   :  { %v106_v35 = vmul.f32 %v832_v26, %v105_v31  ;;  %v144_v36 = vmul.f32 %v836_v33, %v132_v23  ;;  %839 = vrsqrt.f32 %v1029_v28  ;;  %vm150_vm6 = vweird.f32 %v836_v33  ;;  %vm82_vm8 = vmor %vm80_vm7, %vm81_vm3 }
  0x84   :  { %v76_v37 = vmul.f32 %v834_v30, %v75_v34  ;;  %841 = vrsqrt.f32 %v1031_v32  ;;  %vm151_vm11 = vmor %vm149_vm4, %vm150_vm6  ;;  %vm70_vm13 = vweird.f32 %v1031_v32  ;;  %vm90_vm1 = vweird.f32 %v1029_v28 }
  0x85   :  { %v107_v38 = vmul.f32 0.5, %v106_v35  ;;  %v145_v39 = vmul.f32 %v836_v33, %v144_v36 }
  0x86   :  { %v77_v40 = vmul.f32 0.5, %v76_v37 }
  0x87   :  { %v108_v41 = vsub.f32 1.5, %v107_v38  ;;  %v146_v42 = vmul.f32 0.5, %v145_v39  ;;  %v127_v43 = vpop.xlane.xlu1 %126  ;;  %v37_v44 = vpop.xlane.xlu0 %36 }
  0x88   :  { %v1036_v45 = vpop.eup %837  ;;  %v78_v46 = vsub.f32 1.5, %v77_v40  ;;  %v1038_v47 = vmax.f32 %v127_v43, 1e-24  ;;  %v1040_v48 = vmax.f32 %v37_v44, 1e-24 }
  0x89   :  { %v1042_v49 = vpop.eup %839  ;;  %v147_v50 = vsub.f32 1.5, %v146_v42  ;;  %v95_v51 = vmul.f32 %v1036_v45, %v1027_v27  ;;  %v109_v52 = vmul.f32 %v832_v26, %v108_v41  ;;  %vm101_vm10 = vweird.f32 %v1036_v45 }
  0x8a   :  { %v842_v53 = vpop.eup %841  ;;  %v85_v54 = vmul.f32 %v1042_v49, %v1029_v28  ;;  %843 = vrsqrt.f32 %v1038_v47  ;;  %v79_v58 = vmul.f32 %v834_v30, %v78_v46  ;;  %vm91_vm12 = vweird.f32 %v1042_v49  ;;  %vm102_vm15 = vmor %vm100_vm9, %vm101_vm10 }
  0x8b   :  { %v96_v55 = vmul.f32 %v1036_v45, %v95_v51  ;;  %v65_v56 = vmul.f32 %v842_v53, %v1031_v32  ;;  %845 = vrsqrt.f32 %v1040_v48  ;;  %v113_v59 = vsel %vm112_vm5, %v832_v26, %v109_v52  ;;  %vm92_vm2 = vmor %vm90_vm1, %vm91_vm12 }
  0x8c   :  { %v86_v57 = vmul.f32 %v1042_v49, %v85_v54  ;;  %v1054_v62 = vmul.f32 %v113_v59, %v972_v0  ;;  %v148_v63 = vmul.f32 %v836_v33, %v147_v50  ;;  %v83_v4 = vsel %vm82_vm8, %v834_v30, %v79_v58 }
  0x8d   :  { %v97_v60 = vmul.f32 0.5, %v96_v55  ;;  %v66_v61 = vmul.f32 %v842_v53, %v65_v56  ;;  %v116_v10 = vmul.f32 %v83_v4, %v977_v1  ;;  %vm71_vm14 = vweird.f32 %v842_v53 }
  0x8e   :  { %v87_v3 = vmul.f32 0.5, %v86_v57  ;;  %195 = vmatpush.xpose.msra.mxu1 %v1054_v62  ;;  %295 = vmatpush.msra.mxu3 %v1054_v62  ;;  %v152_v11 = vsel %vm151_vm11, %v836_v33, %v148_v63  ;;  %vm72_vm3 = vmor %vm70_vm13, %vm71_vm14  ;;  %vm139_vm4 = vweird.f32 %v1038_v47  ;;  %vm60_vm7 = vweird.f32 %v1040_v48 }
  0x8f   :  { %v98_v5 = vsub.f32 1.5, %v97_v60  ;;  %v67_v6 = vmul.f32 0.5, %v66_v61  ;;  %v154_v14 = vmul.f32 %v152_v11, %v982_v2  ;;  %175 = vmatpush.xpose.msra.mxu0 %v116_v10  ;;  %v573_v26 = vpack.c.bf16 %v116_v10, %v116_v10 }
  0x90   :  { %v844_v0 = vpop.eup %843  ;;  %v88_v12 = vsub.f32 1.5, %v87_v3  ;;  %v576_v38 = vpack.c.bf16 %v1054_v62, %v1054_v62  ;;  %vm491_vm10 = vcmask 1043456   ;;  %v157_v52 = vlaneseq }
  0x91   :  { %v846_v16 = vpop.eup %845  ;;  %v68_v17 = vsub.f32 1.5, %v67_v6  ;;  %v134_v18 = vmul.f32 %v844_v0, %v1038_v47  ;;  %v99_v1 = vmul.f32 %v1036_v45, %v98_v5  ;;  %156 = vst [vmem:[#allocation2 + $0x1] sm:$0x1] %v154_v14  ;;  %vm140_vm5 = vweird.f32 %v844_v0 }
  0x92   :  { %v55_v19 = vmul.f32 %v846_v16, %v1040_v48  ;;  %v89_v20 = vmul.f32 %v1042_v49, %v88_v12  ;;  %vm61_vm6 = vweird.f32 %v846_v16  ;;  %vm141_vm8 = vmor %vm139_vm4, %vm140_vm5  ;;  %v662_v43 = vunpack.c.l.b16 %v576_v38  ;;  %v346_v38 = vld [vmem:[%s1242_s3 + $0x50] sm:$0xff] }
  0x93   :  { %v135_v2 = vmul.f32 %v844_v0, %v134_v18  ;;  %v103_v21 = vsel %vm102_vm15, %v1036_v45, %v99_v1  ;;  %v69_v22 = vmul.f32 %v842_v53, %v68_v17  ;;  %vm62_vm9 = vmor %vm60_vm7, %vm61_vm6  ;;  %vm206_vm14 = vcmask 188416  }
  0x94   :  { %v56_v23 = vmul.f32 %v846_v16, %v55_v19  ;;  %v118_v24 = vmul.f32 %v103_v21, %v994_v7  ;;  %v93_v25 = vsel %vm92_vm2, %v1042_v49, %v89_v20  ;;  %v583_v7 = vunpack.c.l.b16 %v573_v26 }
  0x95   :  { %v136_v27 = vmul.f32 0.5, %v135_v2  ;;  %v73_v28 = vsel %vm72_vm3, %v842_v53, %v69_v22  ;;  %v117_v31 = vmul.f32 %v93_v25, %v999_v8  ;;  %v1088_v48 = vpack.c.b16 %v662_v43, %v662_v43 }
  0x96   :  { %v57_v29 = vmul.f32 0.5, %v56_v23  ;;  %196 = vmatpush.xpose.msra.mxu1 %v118_v24  ;;  %296 = vmatpush.msra.mxu3 %v118_v24  ;;  %v115_v30 = vmul.f32 %v73_v28, %v1004_v9  ;;  %v585_v8 = vpack.c.b16 %v583_v7, %v583_v7  ;;  %v575_v47 = vpack.c.bf16 %v118_v24, %v118_v24 }
  0x97   :  { %v137_v33 = vsub.f32 1.5, %v136_v27  ;;  %v574_v46 = vpack.c.bf16 %v117_v31, %v117_v31  ;;  %v702_v50 = vsel %vm491_vm10, %v1088_v48, 0  ;;  %v1096_v53 = vand.u32 127, %v157_v52 }
  0x98   :  { %v58_v32 = vsub.f32 1.5, %v57_v29  ;;  %176 = vmatpush.xpose.msra.mxu0 %v115_v30  ;;  %297 = vmatpush.msra.mxu3 %v117_v31  ;;  %v572_v40 = vpack.c.bf16 %v115_v30, %v115_v30  ;;  %v623_v42 = vsel %vm491_vm10, %v585_v8, 0  ;;  %v661_v49 = vunpack.c.l.b16 %v575_v47  ;;  %v342_v47 = vld [vmem:[%s1242_s3 + $0x30] sm:$0xff] }
  0x99   :  { %v138_v34 = vmul.f32 %v844_v0, %v137_v33  ;;  %vm159_vm11 = vcmp.eq.s32.totalorder %v1096_v53, 0  ;;  %vm160_vm12 = vcmp.ge.s32.totalorder %v1096_v53, 17  ;;  %vm255_vm4 = vcmask 195584  }
  0x9a   :  { %197 = vmatpush.xpose.msra.mxu1 %v117_v31  ;;  %v59_v35 = vmul.f32 %v846_v16, %v58_v32  ;;  %vm1100_vm13 = vmor %vm159_vm11, %vm160_vm12 }
  0x9b   :  { %v142_v9 = vsel %vm141_vm8, %v844_v0, %v138_v34 }
  0x9c   :  { %v63_v36 = vsel %vm62_vm9, %v846_v16, %v59_v35  ;;  %v153_v37 = vmul.f32 %v142_v9, %v1015_v13  ;;  %v582_v13 = vunpack.c.l.b16 %v572_v40  ;;  %v351_v35 = vld [vmem:[%s1242_s3 + $0x78] sm:$0xff]  ;;  %v350_v9 = vld [vmem:[%s1242_s3 + $0x70] sm:$0xff]  ;;  %v344_v40 = vld [vmem:[%s1242_s3 + $0x40] sm:$0xff] }
  0x9d   :  { %198 = vmatmul.f32.vlgmr.msra.gmra.mxu1 %v154_v14  ;;  %v114_v39 = vmul.f32 %v63_v36, %v1022_v15  ;;  %v660_v15 = vunpack.c.l.b16 %v574_v46  ;;  %358 = vmatpush.xpose.msra.mxu2 %v351_v35  ;;  %v349_v36 = vld [vmem:[%s1242_s3 + $0x68] sm:$0xff] }
  0x9e   :  { %272 = vmatpush.msrb.mxu1 %v116_v10  ;;  %155 = vst [vmem:[#allocation2] sm:$0x1] %v153_v37 }
  0x9f   :  { %177 = vmatpush.xpose.msra.mxu0 %v114_v39  ;;  %v571_v41 = vpack.c.bf16 %v114_v39, %v114_v39  ;;  %v1092_v51 = vpack.c.b16 %v661_v49, %v660_v15  ;;  %v340_v15 = vld [vmem:[%s1242_s3 + $0x20] sm:$0xff]  ;;  %v339_v49 = vld [vmem:[%s1242_s3 + $0x18] sm:$0xff] }
  0xa0   :  { %273 = vmatpush.msrb.mxu1 %v115_v30  ;;  %746 = dma.vmem_to_hbm [thread:$0]  %s739_s18, 32, %s741_s1, [#allocation3], %s926_s19, %s926_s19, %s927_s20  }
  0xa1   :  { %v581_v44 = vunpack.c.l.b16 %v571_v41  ;;  %359 = vmatpush.xpose.msra.mxu2 %v350_v9 }
  0xa2   :  { %274 = vmatpush.msrb.mxu1 %v114_v39  ;;  %178 = vmatmul.f32.vlgmr.msra.gmra.mxu0 %v153_v37  ;;  %v347_v37 = vld [vmem:[%s1242_s3 + $0x58] sm:$0xff]  ;;  %v345_v39 = vld [vmem:[%s1242_s3 + $0x48] sm:$0xff] }
  0xa3   :  { %594 = vmatpush.bf16.xpose.msrb.mxu0 %v585_v8  ;;  %v584_v45 = vpack.c.b16 %v582_v13, %v581_v44  ;;  %v348_v8 = vld [vmem:[%s1242_s3 + $0x60] sm:$0xff] }
  0xa4   :  { %631 = vmatpush.bf16.msra.mxu1 %v623_v42 }
  0xa5   :  { %360 = vmatpush.xpose.msra.mxu2 %v349_v36 }
  0xa8   :  { %632 = vmatpush.bf16.msra.mxu1 %v584_v45 }
  0xa9   :  { %361 = vmatpush.xpose.msra.mxu2 %v348_v8 }
  0xab   :  { %595 = vmatpush.bf16.xpose.msrb.mxu0 %v584_v45  ;;  %v343_v45 = vld [vmem:[%s1242_s3 + $0x38] sm:$0xff] }
  0xad   :  { %362 = vmatpush.xpose.msra.mxu2 %v347_v37 }
  0xb1   :  { %363 = vmatpush.xpose.msra.mxu2 %v346_v38 }
  0xb3   :  { %710 = vmatpush.bf16.msra.mxu0 %v702_v50  ;;  %v338_v50 = vld [vmem:[%s1242_s3 + $0x10] sm:$0xff] }
  0xb5   :  { %364 = vmatpush.xpose.msra.mxu2 %v345_v39 }
  0xb7   :  { %711 = vmatpush.bf16.msra.mxu0 %v1092_v51 }
  0xb9   :  { %365 = vmatpush.xpose.msra.mxu2 %v344_v40 }
  0xbd   :  { %366 = vmatpush.xpose.msra.mxu2 %v343_v45 }
  0xc1   :  { %367 = vmatpush.xpose.msra.mxu2 %v342_v47  ;;  %v923_v47 = vmov 4  }
 0x11a   :  { %v199_v55 = vpop.f32.mrf.mxu1 }
 0x11b   :  { %v205_v56 = vsel %vm1100_vm13, -1e+30, %v199_v55  ;;  %v336_v55 = vld [vmem:[%s1242_s3] sm:$0xff] }
 0x11c   :  { %v210_v57 = vsel %vm206_vm14, %v205_v56, -inf }
 0x11d   :  { %211 = vmax.xlane.f32.xlu2 %v210_v57 }
 0x11f   :  { %v179_v58 = vpop.f32.mrf.mxu0 }
 0x120   :  { %v204_v59 = vsel %vm1100_vm13, -1e+30, %v179_v58 }
 0x121   :  { %v207_v60 = vsel %vm206_vm14, %v204_v59, -inf }
 0x122   :  { %208 = vmax.xlane.f32.xlu0 %v207_v60 }
 0x190   :  { %v212_v61 = vpop.xlane.xlu2 %211 }
 0x191   :  { %v214_v62 = vsub.f32 %v205_v56, %v212_v61 }
 0x193   :  { %v217_v63 = vmul.f32 1.442695, %v214_v62 }
 0x195   :  { %847 = vpow2.f32 %v217_v63  ;;  %v209_v3 = vpop.xlane.xlu0 %208 }
 0x196   :  { %v213_v4 = vsub.f32 %v204_v59, %v209_v3 }
 0x198   :  { %v215_v5 = vmul.f32 1.442695, %v213_v4 }
 0x19a   :  { %849 = vpow2.f32 %v215_v5 }
 0x19b   :  { %v848_v6 = vpop.eup %847 }
 0x19c   :  { %v222_v10 = vsel %vm206_vm14, %v848_v6, 0.0 }
 0x19d   :  { %223 = vadd.xlane.f32.xlu1 %v222_v10 }
 0x1a0   :  { %v850_v11 = vpop.eup %849 }
 0x1a1   :  { %v219_v0 = vsel %vm206_vm14, %v850_v11, 0.0 }
 0x1a2   :  { %220 = vadd.xlane.f32.xlu2 %v219_v0 }
 0x210   :  { %v224_v12 = vpop.xlane.xlu1 %223 }
 0x211   :  { %851 = vrcp.f32 %v224_v12  ;;  %v251_v1 = vand.u32 2147483648, %v224_v12  ;;  %v249_v2 = vand.u32 2147483647, %v224_v12  ;;  %vm245_vm1 = vweird.f32 %v224_v12 }
 0x213   :  { %v252_v23 = vor.u32 1.1754944e-38, %v251_v1  ;;  %vm250_vm3 = vcmp.eq.f32.partialorder %v249_v2, 8.507059e+37 }
 0x215   :  { %v221_v14 = vpop.xlane.xlu2 %220 }
 0x216   :  { %853 = vrcp.f32 %v221_v14  ;;  %v236_v25 = vand.u32 2147483648, %v221_v14  ;;  %v234_v28 = vand.u32 2147483647, %v221_v14  ;;  %vm230_vm6 = vweird.f32 %v221_v14 }
 0x217   :  { %v852_v16 = vpop.eup %851 }
 0x218   :  { %v241_v17 = vmul.f32 %v852_v16, %v224_v12  ;;  %vm246_vm15 = vweird.f32 %v852_v16  ;;  %v237_v33 = vor.u32 1.1754944e-38, %v236_v25  ;;  %vm235_vm8 = vcmp.eq.f32.partialorder %v234_v28, 8.507059e+37 }
 0x219   :  { %vm247_vm2 = vmor %vm245_vm1, %vm246_vm15  ;;  %vm355_vm1 = vcmask 1041409  }
 0x21a   :  { %v242_v18 = vsub.f32 1.0, %v241_v17 }
 0x21c   :  { %v854_v19 = vpop.eup %853  ;;  %v243_v20 = vmul.f32 %v852_v16, %v242_v18 }
 0x21d   :  { %v226_v21 = vmul.f32 %v854_v19, %v221_v14  ;;  %vm231_vm5 = vweird.f32 %v854_v19 }
 0x21e   :  { %v244_v22 = vadd.f32 %v852_v16, %v243_v20  ;;  %vm232_vm7 = vmor %vm230_vm6, %vm231_vm5 }
 0x21f   :  { %v227_v24 = vsub.f32 1.0, %v226_v21 }
 0x220   :  { %v248_v26 = vsel %vm247_vm2, %v852_v16, %v244_v22  ;;  %vm378_vm2 = vcmask 1041408  }
 0x221   :  { %v228_v27 = vmul.f32 %v854_v19, %v227_v24  ;;  %v253_v29 = vsel %vm250_vm3, %v252_v23, %v248_v26 }
 0x222   :  { %v254_v30 = vmul.f32 %v848_v6, %v253_v29 }
 0x223   :  { %v229_v31 = vadd.f32 %v854_v19, %v228_v27 }
 0x224   :  { %779 = vmatmul.msk.f32.vlgmr.msra.gmra.mxu3 %vm255_vm4, %v254_v30 }
 0x225   :  { %v233_v32 = vsel %vm232_vm7, %v854_v19, %v229_v31 }
 0x226   :  { %v238_v7 = vsel %vm235_vm8, %v237_v33, %v233_v32 }
 0x227   :  { %v239_v34 = vmul.f32 %v850_v11, %v238_v7 }
 0x229   :  { %778 = vmatmul.msk.f32.vlgmr.msrb.gmra.mxu1 %vm255_vm4, %v239_v34 }
 0x22a   :  { %673 = vmatpush.bf16.xpose.msrb.mxu1 %v1088_v48  ;;  %v341_v48 = vld [vmem:[%s1242_s3 + $0x28] sm:$0xff] }
 0x22b   :  { %368 = vmatpush.xpose.msra.mxu2 %v341_v48 }
 0x22f   :  { %369 = vmatpush.xpose.msra.mxu2 %v340_v15 }
 0x232   :  { %674 = vmatpush.bf16.xpose.msrb.mxu1 %v1092_v51  ;;  %v337_v51 = vld [vmem:[%s1242_s3 + $0x8] sm:$0xff]  ;;  %s751_s3 = sshll.u32 %s928_s21, 4  ;;  %s752_s3 = int_to_ptr.vmem [resolvable:$true] %s751_s3 }
 0x233   :  { %370 = vmatpush.xpose.msra.mxu2 %v339_v49 }
 0x237   :  { %371 = vmatpush.xpose.msra.mxu2 %v338_v50 }
 0x23b   :  { %372 = vmatpush.xpose.msra.mxu2 %v337_v51 }
 0x23f   :  { %373 = vmatpush.xpose.msra.mxu2 %v336_v55 }
 0x2a6   :  { %v276_v41 = vpop.f32.mrf.mxu1 }
 0x2a7   :  { %v302_v42 = vmul.f32 %v276_v41, %v276_v41  ;;  %v299_v43 = vpop.f32.mrf.mxu3 }
 0x2a8   :  { %v303_v44 = vmul.f32 %v299_v43, %v299_v43 }
 0x2a9   :  { %v304_v13 = vsel %vm124_vm0, %v302_v42, 0.0 }
 0x2aa   :  { %305 = vadd.xlane.f32.xlu1 %v304_v13  ;;  %v307_v46 = vsel %vm124_vm0, %v303_v44, 0.0 }
 0x2ab   :  { %308 = vadd.xlane.f32.xlu0 %v307_v46 }
 0x31d   :  { %v306_v56 = vpop.xlane.xlu1 %305 }
 0x31e   :  { %v310_v57 = vmax.f32 %v306_v56, 1e-24  ;;  %v309_v58 = vpop.xlane.xlu0 %308 }
 0x31f   :  { %v311_v59 = vmax.f32 %v309_v58, 1e-24 }
 0x320   :  { %855 = vrsqrt.f32 %v310_v57  ;;  %vm318_vm11 = vweird.f32 %v310_v57 }
 0x321   :  { %857 = vrsqrt.f32 %v311_v59  ;;  %vm328_vm14 = vweird.f32 %v311_v59 }
 0x326   :  { %v856_v60 = vpop.eup %855 }
 0x327   :  { %v858_v61 = vpop.eup %857  ;;  %v313_v62 = vmul.f32 %v856_v60, %v310_v57  ;;  %vm319_vm0 = vweird.f32 %v856_v60 }
 0x328   :  { %v323_v63 = vmul.f32 %v858_v61, %v311_v59  ;;  %vm329_vm9 = vweird.f32 %v858_v61  ;;  %vm320_vm12 = vmor %vm318_vm11, %vm319_vm0 }
 0x329   :  { %v314_v3 = vmul.f32 %v856_v60, %v313_v62  ;;  %vm330_vm15 = vmor %vm328_vm14, %vm329_vm9  ;;  %vm472_vm14 = vcmask 15360  }
 0x32a   :  { %v324_v4 = vmul.f32 %v858_v61, %v323_v63 }
 0x32b   :  { %v315_v5 = vmul.f32 0.5, %v314_v3 }
 0x32c   :  { %v325_v6 = vmul.f32 0.5, %v324_v4 }
 0x32d   :  { %v316_v10 = vsub.f32 1.5, %v315_v5 }
 0x32e   :  { %v326_v11 = vsub.f32 1.5, %v325_v6 }
 0x32f   :  { %v317_v0 = vmul.f32 %v856_v60, %v316_v10 }
 0x330   :  { %v327_v12 = vmul.f32 %v858_v61, %v326_v11 }
 0x331   :  { %v321_v14 = vsel %vm320_vm12, %v856_v60, %v317_v0  ;;  %vm470_vm12 = vcmask 7168  }
 0x332   :  { %v331_v16 = vsel %vm330_vm15, %v858_v61, %v327_v12  ;;  %v332_v17 = vmul.f32 %v321_v14, %v276_v41 }
 0x333   :  { %v333_v18 = vmul.f32 %v331_v16, %v299_v43 }
 0x334   :  { %334 = vst [vmem:[#allocation4] sm:$0x1] %v332_v17 }
 0x335   :  { %335 = vst [vmem:[#allocation4 + $0x1] sm:$0x1] %v333_v18  ;;  %v354_v1 = vrot.slane %v333_v18, 7 }
 0x336   :  { %759 = dma.vmem_to_hbm [thread:$0]  %s752_s3, 32, %s754_s24, [#allocation5], %s926_s19, %s926_s19, %s927_s20  }
 0x337   :  { %v356_v19 = vsel %vm355_vm1, %v354_v1, %v332_v17 }
 0x338   :  { %374 = vmatmul.f32.vlgmr.msra.gmra.mxu2 %v356_v19 }
 0x3bb   :  { %v375_v20 = vpop.f32.mrf.mxu2 }
 0x3bc   :  { %v379_v2 = vsel %vm378_vm2, %v375_v20, -inf }
 0x3bd   :  { %380 = vmax.xlane.f32.xlu2 %v379_v2  ;;  %v823_v2 = vld [vmem:[%s1241_s2 + $0x30] sm:$0xff] }
 0x430   :  { %v381_v21 = vpop.xlane.xlu2 %380 }
 0x431   :  { %vm382_vm3 = vcmp.ge.f32.partialorder %v375_v20, %v381_v21  ;;  %v822_v21 = vld [vmem:[%s1241_s2 + $0x28] sm:$0xff] }
 0x432   :  { %v383_v22 = vsel %vm382_vm3, %v1096_v53, 128  ;;  %vm474_vm3 = vcmask 23552  }
 0x433   :  { %v384_v23 = vsel %vm378_vm2, %v383_v22, 2147483647  ;;  %v821_v22 = vld [vmem:[%s1241_s2 + $0x20] sm:$0xff] }
 0x434   :  { %v386_v24 = vshra.s32 %v384_v23, 16  ;;  %v385_v26 = vand.u32 65535, %v384_v23 }
 0x436   :  { %v388_v25 = vcvt.s32.f32 %v386_v24  ;;  %v387_v28 = vcvt.s32.f32 %v385_v26 }
 0x438   :  { %389 = vmin.xlane.f32.xlu0 %v388_v25 }
 0x4ab   :  { %v390_v27 = vpop.xlane.xlu0 %389 }
 0x4ac   :  { %vm391_vm5 = vcmp.eq.f32.partialorder %v388_v25, %v390_v27  ;;  %v396_v30 = vcvt.f32.s32 %v390_v27  ;;  %v820_v27 = vld [vmem:[%s1241_s2 + $0x18] sm:$0xff] }
 0x4ad   :  { %v392_v29 = vsel %vm391_vm5, %v387_v28, inf  ;;  %v819_v28 = vld [vmem:[%s1241_s2 + $0x10] sm:$0xff]  ;;  %vm476_vm5 = vcmask 25600  }
 0x4ae   :  { %393 = vmin.xlane.f32.xlu1 %v392_v29  ;;  %v397_v33 = vshll.u32 %v396_v30, 16  ;;  %v818_v29 = vld [vmem:[%s1241_s2 + $0x8] sm:$0xff]  ;;  %v817_v30 = vld [vmem:[%s1241_s2] sm:$0xff] }
 0x521   :  { %v394_v31 = vpop.xlane.xlu1 %393 }
 0x522   :  { %v395_v32 = vcvt.f32.s32 %v394_v31 }
 0x524   :  { %v398_v7 = vadd.s32 %v397_v33, %v395_v32 }
 0x526   :  { %vm399_vm6 = vcmp.eq.s32.totalorder %v1096_v53, %v398_v7 }
 0x527   :  { %v401_v34 = vsel %vm399_vm6, -1e+30, %v375_v20  ;;  %v400_v48 = vsel %vm399_vm6, 0, %v923_v47  ;;  %v824_v20 = vld [vmem:[%s1241_s2 + $0x38] sm:$0xff] }
 0x528   :  { %v402_v35 = vsel %vm378_vm2, %v401_v34, -inf  ;;  %558 = vmatpush.bf16.msrb.mxu3 %v824_v20 }
 0x529   :  { %403 = vmax.xlane.f32.xlu2 %v402_v35  ;;  %v479_v35 = vshrl.u32 %v157_v52, 7 }
 0x52c   :  { %559 = vmatpush.bf16.msrb.mxu3 %v823_v2 }
 0x530   :  { %560 = vmatpush.bf16.msrb.mxu3 %v822_v21 }
 0x534   :  { %561 = vmatpush.bf16.msrb.mxu3 %v821_v22 }
 0x538   :  { %562 = vmatpush.bf16.msrb.mxu3 %v820_v27 }
 0x53c   :  { %563 = vmatpush.bf16.msrb.mxu3 %v819_v28 }
 0x540   :  { %564 = vmatpush.bf16.msrb.mxu3 %v818_v29 }
 0x544   :  { %565 = vmatpush.bf16.msrb.mxu3 %v817_v30 }
 0x59c   :  { %v404_v9 = vpop.xlane.xlu2 %403 }
 0x59d   :  { %vm405_vm7 = vcmp.ge.f32.partialorder %v401_v34, %v404_v9 }
 0x59e   :  { %v406_v36 = vsel %vm405_vm7, %v1096_v53, 128 }
 0x59f   :  { %v407_v8 = vsel %vm378_vm2, %v406_v36, 2147483647 }
 0x5a0   :  { %v409_v37 = vshra.s32 %v407_v8, 16  ;;  %v408_v39 = vand.u32 65535, %v407_v8 }
 0x5a2   :  { %v411_v38 = vcvt.s32.f32 %v409_v37  ;;  %v410_v41 = vcvt.s32.f32 %v408_v39 }
 0x5a4   :  { %412 = vmin.xlane.f32.xlu0 %v411_v38 }
 0x617   :  { %v413_v40 = vpop.xlane.xlu0 %412 }
 0x618   :  { %vm414_vm8 = vcmp.eq.f32.partialorder %v411_v38, %v413_v40  ;;  %v419_v43 = vcvt.f32.s32 %v413_v40  ;;  %v924_v38 = vmov 0.0  }
 0x619   :  { %v415_v42 = vsel %vm414_vm8, %v410_v41, inf }
 0x61a   :  { %416 = vmin.xlane.f32.xlu1 %v415_v42  ;;  %v420_v13 = vshll.u32 %v419_v43, 16 }
 0x68d   :  { %v417_v44 = vpop.xlane.xlu1 %416 }
 0x68e   :  { %v418_v45 = vcvt.f32.s32 %v417_v44 }
 0x690   :  { %v421_v46 = vadd.s32 %v420_v13, %v418_v45 }
 0x692   :  { %vm422_vm0 = vcmp.eq.s32.totalorder %v1096_v53, %v421_v46  ;;  %v471_v10 = vsel %vm470_vm12, %v398_v7, %v421_v46 }
 0x693   :  { %v424_v15 = vsel %vm422_vm0, -1e+30, %v401_v34  ;;  %v423_v49 = vsel %vm422_vm0, 1, %v400_v48 }
 0x694   :  { %v425_v50 = vsel %vm378_vm2, %v424_v15, -inf }
 0x695   :  { %426 = vmax.xlane.f32.xlu2 %v425_v50 }
 0x708   :  { %v427_v51 = vpop.xlane.xlu2 %426 }
 0x709   :  { %vm428_vm9 = vcmp.ge.f32.partialorder %v424_v15, %v427_v51 }
 0x70a   :  { %v429_v55 = vsel %vm428_vm9, %v1096_v53, 128 }
 0x70b   :  { %v430_v56 = vsel %vm378_vm2, %v429_v55, 2147483647 }
 0x70c   :  { %v432_v57 = vshra.s32 %v430_v56, 16  ;;  %v431_v59 = vand.u32 65535, %v430_v56 }
 0x70e   :  { %v434_v58 = vcvt.s32.f32 %v432_v57  ;;  %v433_v61 = vcvt.s32.f32 %v431_v59 }
 0x710   :  { %435 = vmin.xlane.f32.xlu0 %v434_v58 }
 0x783   :  { %v436_v60 = vpop.xlane.xlu0 %435 }
 0x784   :  { %vm437_vm11 = vcmp.eq.f32.partialorder %v434_v58, %v436_v60  ;;  %v442_v63 = vcvt.f32.s32 %v436_v60 }
 0x785   :  { %v438_v62 = vsel %vm437_vm11, %v433_v61, inf }
 0x786   :  { %439 = vmin.xlane.f32.xlu1 %v438_v62  ;;  %v443_v4 = vshll.u32 %v442_v63, 16 }
 0x7f9   :  { %v440_v3 = vpop.xlane.xlu1 %439 }
 0x7fa   :  { %v441_v5 = vcvt.f32.s32 %v440_v3 }
 0x7fc   :  { %v444_v6 = vadd.s32 %v443_v4, %v441_v5 }
 0x7fe   :  { %v473_v11 = vsel %vm472_vm14, %v471_v10, %v444_v6  ;;  %vm445_vm15 = vcmp.eq.s32.totalorder %v1096_v53, %v444_v6 }
 0x7ff   :  { %v447_v0 = vsel %vm445_vm15, -1e+30, %v424_v15  ;;  %v446_v12 = vsel %vm445_vm15, 2, %v423_v49 }
 0x800   :  { %v448_v14 = vsel %vm378_vm2, %v447_v0, -inf }
 0x801   :  { %449 = vmax.xlane.f32.xlu2 %v448_v14 }
 0x874   :  { %v450_v16 = vpop.xlane.xlu2 %449 }
 0x875   :  { %vm451_vm1 = vcmp.ge.f32.partialorder %v447_v0, %v450_v16 }
 0x876   :  { %v452_v17 = vsel %vm451_vm1, %v1096_v53, 128 }
 0x877   :  { %v453_v18 = vsel %vm378_vm2, %v452_v17, 2147483647 }
 0x878   :  { %v455_v1 = vshra.s32 %v453_v18, 16  ;;  %v454_v23 = vand.u32 65535, %v453_v18 }
 0x87a   :  { %v457_v19 = vcvt.s32.f32 %v455_v1  ;;  %v456_v25 = vcvt.s32.f32 %v454_v23 }
 0x87c   :  { %458 = vmin.xlane.f32.xlu0 %v457_v19 }
 0x8ef   :  { %v459_v24 = vpop.xlane.xlu0 %458 }
 0x8f0   :  { %vm460_vm2 = vcmp.eq.f32.partialorder %v457_v19, %v459_v24  ;;  %v465_v31 = vcvt.f32.s32 %v459_v24 }
 0x8f1   :  { %v461_v26 = vsel %vm460_vm2, %v456_v25, inf }
 0x8f2   :  { %462 = vmin.xlane.f32.xlu1 %v461_v26  ;;  %v466_v32 = vshll.u32 %v465_v31, 16 }
 0x965   :  { %v463_v33 = vpop.xlane.xlu1 %462 }
 0x966   :  { %v464_v7 = vcvt.f32.s32 %v463_v33 }
 0x968   :  { %v467_v34 = vadd.s32 %v466_v32, %v464_v7 }
 0x96a   :  { %vm468_vm6 = vcmp.eq.s32.totalorder %v1096_v53, %v467_v34  ;;  %v475_v9 = vsel %vm474_vm3, %v473_v11, %v467_v34 }
 0x96b   :  { %v469_v36 = vsel %vm468_vm6, 3, %v446_v12  ;;  %477 = vst.msk [vmem:[%s1246_s7] sm:$0x3] %vm476_vm5, %v475_v9 }
 0x96c   :  { %v480_v8 = vperm.slane %v469_v36, 0  ;;  %v484_v37 = vperm.slane %v469_v36, 1 }
 0x96e   :  { %vm485_vm7 = vcmp.eq.s32.totalorder %v484_v37, %v479_v35  ;;  %vm481_vm8 = vcmp.eq.s32.totalorder %v480_v8, %v479_v35 }
 0x96f   :  { %v781_v39 = vsel %vm485_vm7, 1.0, %v924_v38  ;;  %v780_v41 = vsel %vm481_vm8, 1.0, %v924_v38 }
 0x970   :  { %v489_v40 = vrot.slane %v781_v39, 4 }
 0x972   :  { %v492_v42 = vsel %vm491_vm10, %v780_v41, %v489_v40 }
 0x973   :  { %v493_v43 = vpack.c.bf16 %v492_v42, %v492_v42 }
 0x975   :  { %566 = vmatmul.bf16.vlgmr.msrb.gmra.mxu3 %v493_v43 }
 0x9f8   :  { %v567_v52 = vpop.f32.mrf.mxu3 }
 0x9f9   :  { %v577_v53 = vpack.c.bf16 %v567_v52, %v567_v52 }
 0x9fb   :  { %596 = vmatmul.bf16.vlgmr.msrb.gmra.mxu0 %v577_v53  ;;  %v655_v62 = vrot.slane %v577_v53, 2 }
 0xa00   :  { %v569_v44 = vpop.f32.mrf.mxu3 }
 0xa78   :  { %v597_v13 = vpop.f32.mrf.mxu0 }
 0xa79   :  { %v601_v45 = vsub.f32 0.0, %v597_v13 }
 0xa7b   :  { %v603_v46 = vrot.slane %v601_v45, 4 }
 0xa7d   :  { %v605_v47 = vsel %vm491_vm10, %v597_v13, %v603_v46 }
 0xa7e   :  { %v606_v48 = vsel %vm1100_vm13, -1e+30, %v605_v47 }
 0xa7f   :  { %v607_v15 = vsel %vm255_vm4, %v606_v48, -inf }
 0xa80   :  { %608 = vmax.xlane.f32.xlu2 %v607_v15  ;;  %v599_v49 = vpop.f32.mrf.mxu0 }
 0xaf3   :  { %v609_v50 = vpop.xlane.xlu2 %608 }
 0xaf4   :  { %v610_v51 = vsub.f32 %v606_v48, %v609_v50 }
 0xaf6   :  { %v611_v55 = vmul.f32 1.442695, %v610_v51 }
 0xaf8   :  { %859 = vpow2.f32 %v611_v55 }
 0xafe   :  { %v860_v56 = vpop.eup %859 }
 0xaff   :  { %v613_v57 = vsel %vm255_vm4, %v860_v56, 0.0 }
 0xb00   :  { %614 = vadd.xlane.f32.xlu0 %v613_v57 }
 0xb73   :  { %v615_v58 = vpop.xlane.xlu0 %614 }
 0xb74   :  { %861 = vrcp.f32 %v615_v58 }
 0xb7a   :  { %v862_v59 = vpop.eup %861 }
 0xb7b   :  { %v617_v60 = vmul.f32 %v862_v59, %v860_v56 }
 0xb7d   :  { %v618_v61 = vpack.c.bf16 %v617_v60, %v617_v60 }
 0xb7f   :  { %814 = vmatmul.msk.bf16.vlgmr.msra.gmra.mxu1 %vm255_vm4, %v618_v61 }
 0xb8f   :  { %675 = vmatmul.bf16.vlgmr.msrb.gmra.mxu1 %v655_v62 }
 0xbfc   :  { %v634_v63 = vpop.f32.mrf.mxu1 }
 0xbfd   :  { %v638_v3 = vmul.f32 %v634_v63, %v634_v63 }
 0xbff   :  { %639 = vadd.xlane.f32.xlu0 %v638_v3 }
 0xc04   :  { %v636_v4 = vpop.f32.mrf.mxu1 }
 0xc0c   :  { %v676_v5 = vpop.f32.mrf.mxu1 }
 0xc0d   :  { %v680_v6 = vsub.f32 0.0, %v676_v5 }
 0xc0f   :  { %v682_v10 = vrot.slane %v680_v6, 4 }
 0xc11   :  { %v684_v11 = vsel %vm491_vm10, %v676_v5, %v682_v10 }
 0xc12   :  { %v685_v0 = vsel %vm1100_vm13, -1e+30, %v684_v11 }
 0xc13   :  { %v686_v12 = vsel %vm255_vm4, %v685_v0, -inf }
 0xc14   :  { %687 = vmax.xlane.f32.xlu1 %v686_v12  ;;  %v678_v14 = vpop.f32.mrf.mxu1 }
 0xc72   :  { %v640_v16 = vpop.xlane.xlu0 %639 }
 0xc73   :  { %v641_v17 = vmax.f32 %v640_v16, 1e-24 }
 0xc75   :  { %863 = vrsqrt.f32 %v641_v17  ;;  %vm648_vm9 = vweird.f32 %v641_v17 }
 0xc7b   :  { %v864_v18 = vpop.eup %863 }
 0xc7c   :  { %v643_v1 = vmul.f32 %v864_v18, %v641_v17  ;;  %vm649_vm0 = vweird.f32 %v864_v18 }
 0xc7d   :  { %vm650_vm11 = vmor %vm648_vm9, %vm649_vm0 }
 0xc7e   :  { %v644_v19 = vmul.f32 %v864_v18, %v643_v1 }
 0xc80   :  { %v645_v20 = vmul.f32 0.5, %v644_v19 }
 0xc82   :  { %v646_v2 = vsub.f32 1.5, %v645_v20 }
 0xc84   :  { %v647_v21 = vmul.f32 %v864_v18, %v646_v2 }
 0xc86   :  { %v651_v22 = vsel %vm650_vm11, %v864_v18, %v647_v21 }
 0xc87   :  { %v652_v23 = vmul.f32 %v651_v22, %v634_v63  ;;  %v688_v54 = vpop.xlane.xlu1 %687 }
 0xc88   :  { %v689_v24 = vsub.f32 %v685_v0, %v688_v54 }
 0xc89   :  { %653 = vst [vmem:[%s1245_s6] sm:$0xff] %v652_v23 }
 0xc8a   :  { %v690_v25 = vmul.f32 1.442695, %v689_v24 }
 0xc8c   :  { %865 = vpow2.f32 %v690_v25 }
 0xc92   :  { %v866_v26 = vpop.eup %865 }
 0xc93   :  { %v692_v27 = vsel %vm255_vm4, %v866_v26, 0.0 }
 0xc94   :  { %693 = vadd.xlane.f32.xlu2 %v692_v27 }
 0xd07   :  { %v694_v28 = vpop.xlane.xlu2 %693 }
 0xd08   :  { %867 = vrcp.f32 %v694_v28 }
 0xd0e   :  { %v868_v29 = vpop.eup %867 }
 0xd0f   :  { %v696_v30 = vmul.f32 %v868_v29, %v866_v26 }
 0xd11   :  { %v697_v31 = vpack.c.bf16 %v696_v30, %v696_v30 }
 0xd13   :  { %815 = vmatmul.msk.bf16.vlgmr.msra.gmra.mxu0 %vm255_vm4, %v697_v31 }
 0xd90   :  { %v713_v33 = vpop.f32.mrf.mxu0 }
 0xd91   :  { %v717_v32 = vmul.f32 %v713_v33, %v713_v33 }
 0xd93   :  { %718 = vadd.xlane.f32.xlu1 %v717_v32 }
 0xd98   :  { %v715_v7 = vpop.f32.mrf.mxu0 }
 0xe06   :  { %v719_v34 = vpop.xlane.xlu1 %718 }
 0xe07   :  { %v720_v35 = vmax.f32 %v719_v34, 1e-24 }
 0xe09   :  { %869 = vrsqrt.f32 %v720_v35  ;;  %vm727_vm13 = vweird.f32 %v720_v35 }
 0xe0f   :  { %v870_v9 = vpop.eup %869 }
 0xe10   :  { %v722_v36 = vmul.f32 %v870_v9, %v720_v35  ;;  %vm728_vm10 = vweird.f32 %v870_v9 }
 0xe11   :  { %vm729_vm4 = vmor %vm727_vm13, %vm728_vm10 }
 0xe12   :  { %v723_v8 = vmul.f32 %v870_v9, %v722_v36 }
 0xe14   :  { %v724_v37 = vmul.f32 0.5, %v723_v8 }
 0xe16   :  { %v725_v38 = vsub.f32 1.5, %v724_v37 }
 0xe18   :  { %v726_v39 = vmul.f32 %v870_v9, %v725_v38 }
 0xe1a   :  { %v730_v40 = vsel %vm729_vm4, %v870_v9, %v726_v39 }
 0xe1b   :  { %v731_v41 = vmul.f32 %v730_v40, %v713_v33 }
 0xe1d   :  { %816 = vst [vmem:[%s1245_s6 + $0x8] sm:$0xff] %v731_v41 }
 0xe1e   :  { %919 = dma.done.wait [#allocation3], 32  }
 0xe1f   :  { %920 = vsyncadd [#allocation3], 4294967264 }
 0xe20   :  { %921 = dma.done.wait [#allocation5], 32  }
 0xe21   :  { %922 = vsyncadd [#allocation5], 4294967264 }
 0xe22   :  { %776 = vsyncpa [#allocation3], 1 }
 0xe23   :  { %777 = vsyncpa [#allocation5], 1 }

</bundles_post_ra>
